<compile_context>
chip_gen: v5e
topology: v5e:2x2
jax: 0.10.0
libtpu: 0.0.40
codegen_flags: <defaults>
</compile_context>

<pallas_src>
import functools

import numpy as np
import jax
import jax.numpy as jnp
from jax.experimental import pallas as pl
from jax.experimental.pallas import tpu as pltpu


def _round_up(x, m):
    return (x + m - 1) // m * m


def _pick_tile(total, cap):
    """Largest tile <= cap, preferring an exact divisor of `total` (no padded work) when one
    exists in the upper half of the range."""
    cap = max(1, min(total, cap))
    for t in range(cap, cap // 2, -1):
        if total % t == 0:
            return t
    return cap


def _vmem_capacity_bytes():
    """Generation-aware VMEM size (128 MiB on v5e/v6e, 64 MiB on v7x); conservative fallback."""
    try:
        cap = getattr(pltpu.get_tpu_info(), "vmem_capacity_bytes", None)
        if cap:
            return int(cap)
    except Exception:
        pass
    return 64 << 20                      # assume the smallest (v7x per-core) if the query fails


def _tile_plan(n, o, l1p, l2p, k1, k2, in_bytes, budget):
    """Pick (batch tile, o tile, l2 tile) so the pipelined working set fits `budget` bytes."""
    out_bytes = 4

    def est(bt, ot, l2t):
        return (2 * bt * l1p * k1 * in_bytes             # x1 tile (double buffered)
                + 2 * bt * k2 * l2t * in_bytes           # x2^T tile (double buffered)
                + 2 * ot * k1 * k2 * in_bytes            # weight tile (counted double buffered)
                + 2 * bt * ot * l1p * l2t * out_bytes    # output tile (double buffered)
                + bt * ot * l1p * k2 * in_bytes          # stage-1 VMEM scratch (single buffer)
                + bt * l1p * max(256, k2) * 4)           # stage-1 f32 matmul intermediate

    # L2 lane-tiling fallback so even a bt=1, ot=1 tile fits (very long sequences; v7x 64 MiB).
    l2t = l2p
    while l2t > 128 and est(1, 1, l2t) > budget:
        l2t = max(128, _round_up(l2t // 2, 128))

    # O tile (bounds weight tile, scratch and the stage-2 M); prefer divisors of O.
    ot_cap = max(1, min(o, 8))
    while ot_cap > 1 and est(1, ot_cap, l2t) > budget:
        ot_cap //= 2
    ot = _pick_tile(o, ot_cap)

    # Batch tile: target first-matmul M = bt*l1p >= 256 and amortize ~0.35us/step grid overhead.
    bt_cap = max(1, min(n, max(1, 256 // l1p)))
    while bt_cap > 1 and est(bt_cap, ot, l2t) > budget:
        bt_cap //= 2
    # Single o-tile (e.g. arc scorer, O=1): keep >= 2 steps on a 'parallel' grid axis so the
    # second TensorCore of a v7x megacore is never idle.
    if (o + ot - 1) // ot == 1 and n >= 2:
        bt_cap = min(bt_cap, (n + 1) // 2)
    bt = _pick_tile(n, bt_cap)

    return bt, ot, l2t, est(bt, ot, l2t)


def _biaffine_kernel(x1_ref, x2t_ref, w_ref, out_ref, t_ref, *, bt, ot, g, l1p, k2):
    # x1_ref : (bt, l1p, k1)         activations; biaffine ones column folded into the zero pad
    # x2t_ref: (bt, k2,  l2t)        pre-transposed: contraction dim on sublanes, lanes = l2t
    # w_ref  : (ot//g, k1, g*k2)     g output channels packed along lanes (first-matmul N = g*k2)
    # out_ref: (bt, ot*l1p, l2t)     float32, lane dense
    # t_ref  : (bt, ot*l1p, k2)      persistent VMEM scratch holding the stage-1 result

    # ---- stage 1: t[b, o*l1p + i, c] = sum_a x1a[b, i, a] * Wp[a, o, c] ----------------------
    # Only on the first L2 step; the scratch persists across grid iterations, so later L2 tiles
    # of the same (o-tile, batch-tile) reuse it instead of recomputing the first matmul.
    @pl.when(pl.program_id(2) == 0)
    def _stage1():
        k1 = x1_ref.shape[-1]
        # Leading-dim merge is layout preserving (l1p a multiple of the sublane tile, k1 % 128 == 0).
        x1_all = x1_ref[...].reshape(bt * l1p, k1)
        for og in range(ot // g):          # tiny static loop -> all slices below static & aligned
            res = jnp.dot(x1_all, w_ref[og], preferred_element_type=jnp.float32)  # (bt*l1p, g*k2)
            for j in range(g):
                o_idx = og * g + j
                # 128-aligned lane slice, a single down-cast (only cast before the 2nd matmul),
                # a leading-dim split and a tile-aligned sublane scatter: all layout preserving.
                part = res[:, j * k2:(j + 1) * k2].astype(t_ref.dtype).reshape(bt, l1p, k2)
                t_ref[:, o_idx * l1p:(o_idx + 1) * l1p, :] = part

    # ---- stage 2: out[b, o*l1p + i, j] = sum_c t[b, o*l1p + i, c] * x2a[b, j, c] -------------
    # One big-M (ot*l1p, k2) @ (k2, l2t) matmul and one large lane-dense store per batch element.
    def _stage2(b, carry):
        s = jnp.dot(t_ref[b], x2t_ref[b], preferred_element_type=jnp.float32)
        out_ref[b] = s.astype(out_ref.dtype)
        return carry

    jax.lax.fori_loop(0, bt, _stage2, 0, unroll=True)


def pairwise_biaffine_scorer(input1, input2, weight, *, compute_dtype=jnp.float32,
                             channels_last=True):
    """input1: (N, L1, D1), input2: (N, L2, D2), weight: (D1+1, D2+1, O).

    Returns (N, L1, L2, O) float32 (the module's contract).  With channels_last=False the
    kernel's (N, O, L1, L2) layout is returned directly so a downstream consumer can fuse the
    relayout instead of paying an extra HBM round trip when O is large.
    """
    n, l1, d1 = input1.shape
    n2, l2, d2 = input2.shape
    assert n == n2
    d1p, d2p, o = weight.shape
    assert d1p == d1 + 1 and d2p == d2 + 1

    in_bytes = jnp.dtype(compute_dtype).itemsize
    sub = 8 * max(1, 4 // in_bytes)      # sublane tile of the compute dtype (8 f32 / 16 bf16)

    # MXU / lane aligned padded sizes (padding is numerically exact: padded lanes are zero).
    k1 = _round_up(d1p, 128)             # contraction dim 1
    k2 = _round_up(d2p, 128)             # contraction dim 2
    l1p = _round_up(l1, sub)             # sublane-tile aligned M (keeps scratch slices aligned)
    l2p = _round_up(l2, 128)             # lane-dense output / x2 length

    vmem_cap = _vmem_capacity_bytes()
    # ~56 MiB working-set budget on 128-MiB parts (v5e/v6e), ~24 MiB on 64-MiB v7x.
    budget = min(56 << 20, max(20 << 20, vmem_cap // 2 - (8 << 20)))
    bt, ot, l2t, vmem_est = _tile_plan(n, o, l1p, l2p, k1, k2, in_bytes, budget)

    # Output-channel lane packing for the first matmul (N = g*k2 fills a 256-wide MXU).
    g = max(1, min(ot, 256 // k2))
    if ot % g:
        g = 1
    ng = ot // g

    n_pad = _round_up(n, bt)
    o_pad = _round_up(o, ot)
    o_tiles, n_tiles = o_pad // ot, n_pad // bt
    l2_tiles = (l2p + l2t - 1) // l2t
    l2_full = l2_tiles * l2t

    # x1a: biaffine ones column folded into the zero pad (single padded buffer build).
    x1p = jnp.zeros((n_pad, l1p, k1), compute_dtype)
    x1p = x1p.at[:n, :l1, :d1].set(input1.astype(compute_dtype))
    x1p = x1p.at[:n, :l1, d1].set(1.0)

    # x2a: same, then transposed ONCE in XLA so the kernel contracts over a leading dim.
    x2p = jnp.zeros((n_pad, l2_full, k2), compute_dtype)
    x2p = x2p.at[:n, :l2, :d2].set(input2.astype(compute_dtype))
    x2p = x2p.at[:n, :l2, d2].set(1.0)
    x2tp = x2p.transpose(0, 2, 1)                               # (n_pad, k2, l2_full)

    # Weight exactly as the PyTorch view/bmm trick consumes it: Wp = W.reshape(D1p, O, D2p),
    # output-channel leading, zero padded, then g channels packed along lanes per row.
    w_eff = weight.reshape(d1p, o, d2p).transpose(1, 0, 2).astype(compute_dtype)   # (o, d1p, d2p)
    w_pad = jnp.zeros((o_pad, k1, k2), compute_dtype).at[:o, :d1p, :d2p].set(w_eff)
    w_p = (w_pad.reshape(o_tiles, ng, g, k1, k2)
                .transpose(0, 1, 3, 2, 4)
                .reshape(o_tiles * ng, k1, g * k2))

    kernel = functools.partial(_biaffine_kernel, bt=bt, ot=ot, g=g, l1p=l1p, k2=k2)
    vmem_limit = int(min(vmem_cap - (4 << 20), max(32 << 20, vmem_est + (8 << 20))))

    # Grid: o-tiles outermost (the weight block index is constant across both inner axes, so it
    # is not re-fetched per step), batch tiles next, L2 lane tiles innermost ("arbitrary": the
    # stage-1 scratch is carried across it).
    grid = (o_tiles, n_tiles, l2_tiles)

    out_k = pl.pallas_call(
        kernel,
        out_shape=jax.ShapeDtypeStruct((n_pad, o_pad * l1p, l2_full), jnp.float32),
        grid_spec=pltpu.PrefetchScalarGridSpec(
            num_scalar_prefetch=0,
            grid=grid,
            in_specs=[
                pl.BlockSpec((bt, l1p, k1), lambda ob, nb, lb: (nb, 0, 0)),
                pl.BlockSpec((bt, k2, l2t), lambda ob, nb, lb: (nb, 0, lb)),
                # Weight block constant across the inner grid axes (not re-DMA'd per step); the
                # VMEM budget above conservatively counts it double-buffered.
                pl.BlockSpec((ng, k1, g * k2), lambda ob, nb, lb: (ob, 0, 0)),
            ],
            out_specs=pl.BlockSpec((bt, ot * l1p, l2t), lambda ob, nb, lb: (nb, ob, lb)),
            scratch_shapes=[pltpu.VMEM((bt, ot * l1p, k2), compute_dtype)],
        ),
        compiler_params=pltpu.CompilerParams(
            dimension_semantics=("parallel", "parallel", "arbitrary"),
            vmem_limit_bytes=vmem_limit,
        ),
    )(x1p, x2tp, w_p)

    out = out_k.reshape(n_pad, o_pad, l1p, l2_full)[:n, :o, :l1, :l2]   # (N, O, L1, L2)
    if channels_last:
        # Module contract: (N, L1, L2, O).  For large O a downstream consumer can instead take
        # channels_last=False and fuse this relayout to avoid an extra HBM round trip.
        out = out.transpose(0, 2, 3, 1)
    return out


def _reference(input1, input2, weight):
    """Pure-JAX reference of the exact PyTorch forward semantics."""
    n, l1, d1 = input1.shape
    _, l2, d2 = input2.shape
    d1p, d2p, o = weight.shape
    x1a = jnp.concatenate([input1, jnp.ones((n, l1, 1), input1.dtype)], axis=-1)
    x2a = jnp.concatenate([input2, jnp.ones((n, l2, 1), input2.dtype)], axis=-1)
    wp = weight.reshape(d1p, o, d2p)   # how the PyTorch view/bmm trick actually indexes W
    return jnp.einsum("nia,aob,njb->nijo", x1a, wp, x2a)


if __name__ == "__main__":
    key = jax.random.PRNGKey(0)

    # Case 1: small shapes implied by the module (batch=2, seq=8, hidden=32, O=4).
    N, L1, L2, D1, D2, O = 2, 8, 8, 32, 32, 4
    ka, kb, kc = jax.random.split(key, 3)
    input1 = jax.random.normal(ka, (N, L1, D1), dtype=jnp.float32)
    input2 = jax.random.normal(kb, (N, L2, D2), dtype=jnp.float32)
    # NOTE: the reference __init__ zero-inits the weight (and the bias is never used in forward);
    # a deterministic random weight is used so the kernel is actually exercised.
    weight = 0.05 * jax.random.normal(kc, (D1 + 1, D2 + 1, O), dtype=jnp.float32)

    ref = _reference(input1, input2, weight)
    out_f32 = jax.block_until_ready(pairwise_biaffine_scorer(input1, input2, weight))
    assert out_f32.shape == (N, L1, L2, O), out_f32.shape
    np.testing.assert_allclose(np.asarray(out_f32), np.asarray(ref), rtol=1e-5, atol=1e-5)

    # bf16-input / f32-accumulate fast path (single intermediate down-cast before the 2nd matmul).
    out_bf16 = jax.block_until_ready(
        pairwise_biaffine_scorer(input1, input2, weight, compute_dtype=jnp.bfloat16))
    np.testing.assert_allclose(np.asarray(out_bf16), np.asarray(ref), rtol=1e-1, atol=1e-1)

    # Case 2: odd shapes — exercises L/D/O padding, multiple o-tiles and divisor-friendly tiling.
    N2, L1b, L2b, D1b, D2b, Ob = 3, 9, 17, 20, 24, 10
    kd, ke, kf = jax.random.split(jax.random.PRNGKey(1), 3)
    i1b = jax.random.normal(kd, (N2, L1b, D1b), dtype=jnp.float32)
    i2b = jax.random.normal(ke, (N2, L2b, D2b), dtype=jnp.float32)
    wb = 0.05 * jax.random.normal(kf, (D1b + 1, D2b + 1, Ob), dtype=jnp.float32)
    refb = _reference(i1b, i2b, wb)
    outb = jax.block_until_ready(pairwise_biaffine_scorer(i1b, i2b, wb))
    assert outb.shape == (N2, L1b, L2b, Ob), outb.shape
    np.testing.assert_allclose(np.asarray(outb), np.asarray(refb), rtol=1e-5, atol=1e-5)

    print("KERNEL_OK")
</pallas_src>

<mosaic_0001>
module attributes {stable_mosaic.version = 11 : i64} {
  func.func @_biaffine_kernel(%arg0: i32, %arg1: i32, %arg2: i32, %arg3: memref<1x8x128xf32, #tpu.memory_space<vmem>>, %arg4: memref<1x128x128xf32, #tpu.memory_space<vmem>>, %arg5: memref<2x128x256xf32, #tpu.memory_space<vmem>>, %arg6: memref<1x32x128xf32, #tpu.memory_space<vmem>>, %arg7: memref<1x32x128xf32, #tpu.memory_space<vmem>>) attributes {dimension_semantics = [#tpu.dimension_semantics<parallel>, #tpu.dimension_semantics<parallel>, #tpu.dimension_semantics<arbitrary>], iteration_bounds = array<i64: 1, 2, 1>, scalar_prefetch = 0 : i64, scratch_operands = 1 : i64, tpu.core_type = #tpu.core_type<tc>, window_params = [{transform_indices = @transform_0, window_bounds = array<i64: 1, 8, 128>}, {transform_indices = @transform_1, window_bounds = array<i64: 1, 128, 128>}, {transform_indices = @transform_2, window_bounds = array<i64: 2, 128, 256>}, {transform_indices = @transform_3, window_bounds = array<i64: 1, 32, 128>}]} {
    %c0_i32 = arith.constant 0 : i32
    %0 = arith.cmpi eq, %arg2, %c0_i32 : i32
    %1 = arith.extui %0 : i1 to i32
    %c0_i32_0 = arith.constant 0 : i32
    %2 = arith.cmpi ne, %1, %c0_i32_0 : i32
    scf.if %2 {
      %c0_7 = arith.constant 0 : index
      %c0_8 = arith.constant 0 : index
      %c0_9 = arith.constant 0 : index
      %14 = vector.load %arg3[%c0_7, %c0_8, %c0_9] : memref<1x8x128xf32, #tpu.memory_space<vmem>>, vector<1x8x128xf32>
      %15 = vector.shape_cast %14 : vector<1x8x128xf32> to vector<8x128xf32>
      %c0_10 = arith.constant 0 : index
      %c0_11 = arith.constant 0 : index
      %c0_12 = arith.constant 0 : index
      %16 = vector.load %arg5[%c0_10, %c0_11, %c0_12] : memref<2x128x256xf32, #tpu.memory_space<vmem>>, vector<1x128x256xf32>
      %17 = vector.shape_cast %16 : vector<1x128x256xf32> to vector<128x256xf32>
      %cst_13 = arith.constant dense<0.000000e+00> : vector<8x256xf32>
      %18 = tpu.matmul %15, %17, %cst_13 {dimension_numbers = #tpu.dot_dimension_numbers<[1], [0], [0], [1], [0, 0, 1, 1], [], []>} : vector<8x128xf32>, vector<128x256xf32>, vector<8x256xf32> -> vector<8x256xf32>
      %19 = vector.extract_strided_slice %18 {offsets = [0, 0], sizes = [8, 128], strides = [1, 1]} : vector<8x256xf32> to vector<8x128xf32>
      %20 = vector.shape_cast %19 : vector<8x128xf32> to vector<1x8x128xf32>
      %c0_14 = arith.constant 0 : index
      %c0_15 = arith.constant 0 : index
      %c0_16 = arith.constant 0 : index
      %21 = vector.load %arg7[%c0_14, %c0_15, %c0_16] : memref<1x32x128xf32, #tpu.memory_space<vmem>>, vector<1x8x128xf32>
      tpu.vector_store %arg7[%c0_14, %c0_15, %c0_16], %20 {strides = array<i32>} : memref<1x32x128xf32, #tpu.memory_space<vmem>>, vector<1x8x128xf32>,
      %22 = vector.extract_strided_slice %18 {offsets = [0, 128], sizes = [8, 128], strides = [1, 1]} : vector<8x256xf32> to vector<8x128xf32>
      %23 = vector.shape_cast %22 : vector<8x128xf32> to vector<1x8x128xf32>
      %c0_17 = arith.constant 0 : index
      %c8 = arith.constant 8 : index
      %c0_18 = arith.constant 0 : index
      %24 = vector.load %arg7[%c0_17, %c8, %c0_18] : memref<1x32x128xf32, #tpu.memory_space<vmem>>, vector<1x8x128xf32>
      tpu.vector_store %arg7[%c0_17, %c8, %c0_18], %23 {strides = array<i32>} : memref<1x32x128xf32, #tpu.memory_space<vmem>>, vector<1x8x128xf32>,
      %c1 = arith.constant 1 : index
      %c0_19 = arith.constant 0 : index
      %c0_20 = arith.constant 0 : index
      %25 = vector.load %arg5[%c1, %c0_19, %c0_20] : memref<2x128x256xf32, #tpu.memory_space<vmem>>, vector<1x128x256xf32>
      %26 = vector.shape_cast %25 : vector<1x128x256xf32> to vector<128x256xf32>
      %cst_21 = arith.constant dense<0.000000e+00> : vector<8x256xf32>
      %27 = tpu.matmul %15, %26, %cst_21 {dimension_numbers = #tpu.dot_dimension_numbers<[1], [0], [0], [1], [0, 0, 1, 1], [], []>} : vector<8x128xf32>, vector<128x256xf32>, vector<8x256xf32> -> vector<8x256xf32>
      %28 = vector.extract_strided_slice %27 {offsets = [0, 0], sizes = [8, 128], strides = [1, 1]} : vector<8x256xf32> to vector<8x128xf32>
      %29 = vector.shape_cast %28 : vector<8x128xf32> to vector<1x8x128xf32>
      %c0_22 = arith.constant 0 : index
      %c16 = arith.constant 16 : index
      %c0_23 = arith.constant 0 : index
      %30 = vector.load %arg7[%c0_22, %c16, %c0_23] : memref<1x32x128xf32, #tpu.memory_space<vmem>>, vector<1x8x128xf32>
      tpu.vector_store %arg7[%c0_22, %c16, %c0_23], %29 {strides = array<i32>} : memref<1x32x128xf32, #tpu.memory_space<vmem>>, vector<1x8x128xf32>,
      %31 = vector.extract_strided_slice %27 {offsets = [0, 128], sizes = [8, 128], strides = [1, 1]} : vector<8x256xf32> to vector<8x128xf32>
      %32 = vector.shape_cast %31 : vector<8x128xf32> to vector<1x8x128xf32>
      %c0_24 = arith.constant 0 : index
      %c24 = arith.constant 24 : index
      %c0_25 = arith.constant 0 : index
      %33 = vector.load %arg7[%c0_24, %c24, %c0_25] : memref<1x32x128xf32, #tpu.memory_space<vmem>>, vector<1x8x128xf32>
      tpu.vector_store %arg7[%c0_24, %c24, %c0_25], %32 {strides = array<i32>} : memref<1x32x128xf32, #tpu.memory_space<vmem>>, vector<1x8x128xf32>,
    } else {
    }
    %c0_i32_1 = arith.constant 0 : i32
    %3 = arith.index_cast %c0_i32_1 : i32 to index
    %c0 = arith.constant 0 : index
    %c0_2 = arith.constant 0 : index
    %4 = vector.load %arg7[%3, %c0, %c0_2] : memref<1x32x128xf32, #tpu.memory_space<vmem>>, vector<1x32x128xf32>
    %5 = vector.shape_cast %4 : vector<1x32x128xf32> to vector<32x128xf32>
    %6 = arith.index_cast %c0_i32_1 : i32 to index
    %c0_3 = arith.constant 0 : index
    %c0_4 = arith.constant 0 : index
    %7 = vector.load %arg4[%6, %c0_3, %c0_4] : memref<1x128x128xf32, #tpu.memory_space<vmem>>, vector<1x128x128xf32>
    %8 = vector.shape_cast %7 : vector<1x128x128xf32> to vector<128x128xf32>
    %cst = arith.constant dense<0.000000e+00> : vector<32x128xf32>
    %9 = tpu.matmul %5, %8, %cst {dimension_numbers = #tpu.dot_dimension_numbers<[1], [0], [0], [1], [0, 0, 1, 1], [], []>} : vector<32x128xf32>, vector<128x128xf32>, vector<32x128xf32> -> vector<32x128xf32>
    %10 = arith.index_cast %c0_i32_1 : i32 to index
    %c0_5 = arith.constant 0 : index
    %c0_6 = arith.constant 0 : index
    %11 = vector.load %arg6[%10, %c0_5, %c0_6] : memref<1x32x128xf32, #tpu.memory_space<vmem>>, vector<1x32x128xf32>
    %12 = vector.shape_cast %11 : vector<1x32x128xf32> to vector<32x128xf32>
    %13 = vector.shape_cast %9 : vector<32x128xf32> to vector<1x32x128xf32>
    tpu.vector_store %arg6[%10, %c0_5, %c0_6], %13 {strides = array<i32>} : memref<1x32x128xf32, #tpu.memory_space<vmem>>, vector<1x32x128xf32>,
    %c1_i32 = arith.constant 1 : i32
    return
  }
  func.func @transform_0(%arg0: i32, %arg1: i32, %arg2: i32) -> (i32, i32, i32) {
    %c0_i32 = arith.constant 0 : i32
    %c0_i32_0 = arith.constant 0 : i32
    %c0_i32_1 = arith.constant 0 : i32
    return %arg1, %c0_i32, %c0_i32_0 : i32, i32, i32
  }
  func.func @transform_1(%arg0: i32, %arg1: i32, %arg2: i32) -> (i32, i32, i32) {
    %c0_i32 = arith.constant 0 : i32
    %c0_i32_0 = arith.constant 0 : i32
    return %arg1, %c0_i32, %arg2 : i32, i32, i32
  }
  func.func @transform_2(%arg0: i32, %arg1: i32, %arg2: i32) -> (i32, i32, i32) {
    %c0_i32 = arith.constant 0 : i32
    %c0_i32_0 = arith.constant 0 : i32
    %c0_i32_1 = arith.constant 0 : i32
    return %arg0, %c0_i32, %c0_i32_0 : i32, i32, i32
  }
  func.func @transform_3(%arg0: i32, %arg1: i32, %arg2: i32) -> (i32, i32, i32) {
    %c0_i32 = arith.constant 0 : i32
    return %arg1, %arg0, %arg2 : i32, i32, i32
  }
}

</mosaic_0001>

<bundles_post_ra>
// kernel: tpu_custom_call.1
= control target key start
LH: loop header
LB: loop body
LE: loop exit
PB: predicated region body
PF: predicated region fallthrough
CT: control target
= control target key end

     0   :  { %s1138_s0 = inlined_call_operand.hbm [shape: f32[2,8,128], index: 0, kind: input, shape index: {}]   ;;  %s1139_s1 = inlined_call_operand.hbm [shape: f32[2,128,128], index: 1, kind: input, shape index: {}]   ;;  %s1140_s2 = inlined_call_operand.hbm [shape: f32[2,128,256], index: 2, kind: input, shape index: {}]   ;;  %s1141_s3 = inlined_call_operand.hbm [shape: f32[2,32,128], index: 3, kind: output, shape index: {}]  }
   0x1   :  { %1143 = sst [smem:[#allocation15_spill]] %s1138_s0 }
   0x2   :  { %1144 = sst [smem:[#allocation16_spill]] %s1140_s2 }
   0x3   :  { %8 = vsyncpa [#allocation4], 0 }
   0x4   :  { %10 = vsyncpa [#allocation4 + $0x1], 0 }
   0x5   :  { %11 = vsyncpa [#allocation7], 0 }
   0x6   :  { %13 = vsyncpa [#allocation7 + $0x1], 0 }
   0x7   :  { %14 = vsyncpa [#allocation5], 0 }
   0x8   :  { %16 = vsyncpa [#allocation5 + $0x1], 0  ;;  %s948_s12 = smov 0   ;;  %s950_s13 = smov 0  }
   0x9   :  { %s952_s14 = smov 0   ;;  %s954_s15 = smov 0  }
   0xa   :  { %s956_s16 = smov 0   ;;  %s958_s17 = smov 0  }
   0xb LB: > { %s979_s18 = sadd.s32 4294967295, %s919_s17   ;;  %p635_p0 = scmp.ge.s32.totalorder %s919_s17, 1  ;;  %s919_s17 = sphi %s958_s17, %s22_s17   ;;  %s915_s16 = sphi %s956_s16, %s1159_s16   ;;  %s911_s15 = sphi %s954_s15, %s1158_s15   ;;  %s907_s14 = sphi %s952_s14, %s1157_s14   ;;  %s903_s13 = sphi %s950_s13, %s1156_s13   ;;  %s899_s12 = sphi %s948_s12, %s1155_s12  }
   0xc   : > { %p62_p1 = scmp.eq.s32.totalorder %s979_s18, 0  ;;  %p156_p2 = scmp.lt.s32.totalorder %s919_s17, 3 }
   0xd   : > { %s1145_s2 = sld [smem:[#allocation16_spill]]  ;;  %s921_s23 = smov [#allocation8]  }
   0xe   : > { %p987_p3 = pnand %p635_p0, %p156_p2  ;;  %s173_s24 = sshll.u32 %s921_s23, 4  ;;  %s174_s24 = int_to_ptr.vmem [resolvable:$true] %s173_s24 }
   0xf   : > { %p637_p6 = scmp.ge.s32.totalorder %s919_s17, 2  ;;  %s922_s25 = smov 256  }
  0x10   : > { %p665_p4 = pneg %p987_p3  ;;  %s923_s26 = smov 16  }
  0x11   : > { %s634_s27 = sadd.s32 4294967294, %s919_s17   ;;  %s37_s28 = sadd.s32 1, %s915_s16 }
  0x12   : > { %p666_p5 = pnand %p665_p4, %p62_p1  ;;  %s48_s29 = sadd.s32 1, %s907_s14 }
  0x13   : > { %s171_s21 = sshll.u32 %s1145_s2, 4  ;;  %p39_p7 = scmp.ge.s32.totalorder %s37_s28, 2  ;;  %s172_s21 = int_to_ptr.hbm [resolvable:$true] %s171_s21 }
  0x14   : > { %668 = dma.hbm_to_vmem [thread:$0]  (!%p666_p5), %s172_s21, 8192, %s174_s24, [#allocation7], %s922_s25, %s922_s25, %s923_s26  }
  0x15   : > { %p55_p8 = scmp.ne.s32.totalorder %s907_s14, %s903_s13  ;;  %p56_p9 = scmp.eq.s32.totalorder %s919_s17, 0 }
  0x16   : > { %p61_p10 = scmp.ne.s32.totalorder %s903_s13, %s899_s12  ;;  %s1161_s28 = smov (%p39_p7, %s37_s28), 0 }
  0x17   : > { %1147 = sst [smem:[#allocation14_spill]] %s1161_s28  ;;  %p1006_p11 = por %p56_p9, %p55_p8 }
  0x18   : > { %p1012_p12 = por %p62_p1, %p61_p10  ;;  %s45_s5 = ssub.s32 %s915_s16, %s1161_s28 }
  0x19   : > { %p143_p13 = scmp.eq.s32.totalorder %s979_s18, 1  ;;  %p46_p0 = scmp.eq.s32.totalorder %s45_s5, 0 }
  0x1a   : > { %p149_p2 = scmp.eq.s32.totalorder %s634_s27, 1  ;;  %p681_p5 = scmp.lt.s32.totalorder %s919_s17, 2 }
  0x1b   : > { %p1019_p4 = por %p143_p13, %p55_p8  ;;  %s187_s9 = sand.u32 1, %s907_s14  }
  0x1c   : > { %s1025_s7 = scalar_select %p46_p0, %s907_s14, %s48_s29  }
  0x1d   : > { %p1027_p7 = por %p149_p2, %p61_p10  ;;  %s638_s10 = sshll.u32 %s187_s9, 3 }
  0x1e   : > { %s639_s11 = sshll.u32 %s915_s16, 3  ;;  %s1152_s0 = sld [smem:[#allocation15_spill]] }
  0x1f   : > { %s191_s23 = scalar_lea.vmem [#allocation3], %s638_s10  ;;  %p1038_p8 = pnand %p681_p5, %p1006_p11 }
  0x20   : > { %s199_s24 = sshll.u32 %s191_s23, 4  ;;  %s640_s27 = sshll.u32 %s187_s9, 7  ;;  %s200_s24 = int_to_ptr.vmem [resolvable:$true] %s199_s24 }
  0x21   : > { %s653_s29 = sshll.u32 %s915_s16, 7  ;;  %s188_s5 = scalar_lea.sflag [#allocation4], %s187_s9 }
  0x22   : > { %s210_s2 = scalar_lea.vmem [#allocation6], %s640_s27  ;;  %s925_s28 = smov 8  }
  0x23   : > { %s219_s19 = sshll.u32 %s210_s2, 4  ;;  %s1054_s9 = sand.u32 (!%p987_p3), 1, %s903_s13   ;;  %s220_s19 = int_to_ptr.vmem [resolvable:$true] %s219_s19 }
  0x24   : > { %s195_s21 = scalar_lea.hbm %s1152_s0, %s639_s11  ;;  %s206_s11 = sand.u32 1, %s919_s17  }
  0x25   : > { %s197_s25 = sshll.u32 %s195_s21, 4  ;;  %s216_s21 = scalar_lea.hbm %s1139_s1, %s653_s29  ;;  %s198_s25 = int_to_ptr.hbm [resolvable:$true] %s197_s25 }
  0x26   : > { %672 = dma.hbm_to_vmem [thread:$0]  (!%p1038_p8), %s198_s25, 128, %s200_s24, %s188_s5  }
  0x27   : > { %s217_s30 = sshll.u32 %s216_s21, 4  ;;  %s207_s23 = scalar_lea.sflag [#allocation7], %s206_s11  ;;  %s218_s30 = int_to_ptr.hbm [resolvable:$true] %s217_s30 }
  0x28   : > { %s924_s0 = smov 128   ;;  %231 = sbr.rel (%p987_p3) target bundleno = 387 (0x183), region = 32 }
  0x29   : > { %675 = dma.hbm_to_vmem [thread:$0]  (!%p1038_p8), %s218_s30, 2048, %s220_s19, %s207_s23, %s924_s0, %s924_s0, %s925_s28  }
  0x2a   : > { %s644_s2 = sshll.u32 (!%p987_p3), %s1054_s9, 3  ;;  %s234_s24 = scalar_lea.sflag (!%p987_p3), [#allocation4], %s1054_s9 }
  0x2b   : > { %s1058_s25 = scalar_lea.vmem (!%p987_p3), [#allocation3], %s644_s2 }
  0x2d   : > { %882 = dma.done.wait (%p1012_p12), %s234_s24, 128  }
  0x2e   : > { %884 = vsyncadd (%p1012_p12), %s234_s24, 4294967168  ;;  %s243_s0 = sand.u32 1, %s979_s18   ;;  %s645_s22 = sshll.u32 %s1054_s9, 7 }
  0x2f   : > { %s244_s28 = scalar_lea.sflag [#allocation7], %s243_s0  ;;  %s1066_s26 = scalar_lea.vmem [#allocation6], %s645_s22 }
  0x30   : > { %886 = dma.done.wait (%p1012_p12), %s244_s28, 2048  }
  0x31   : > { %888 = vsyncadd (%p1012_p12), %s244_s28, 4294965248 }
  0x32   : > { %890 = dma.done.wait (%p62_p1), [#allocation7], 8192  }
  0x33   : > { %892 = vsyncadd (%p62_p1), [#allocation7], 4294959104  ;;  %v318_v0 = vld [vmem:[#allocation8 + $0xf0] sm:$0xff]  ;;  %v316_v1 = vld [vmem:[#allocation8 + $0xe0] sm:$0xff]  ;;  %s647_s18 = sshll.u32 %s1054_s9, 5  ;;  %s654_s27 = sshll.u32 %s911_s15, 5 }
  0x34   : > { %320 = vmatpush.msra.mxu1 %v318_v0  ;;  %v314_v2 = vld [vmem:[#allocation8 + $0xd0] sm:$0xff]  ;;  %v312_v3 = vld [vmem:[#allocation8 + $0xc0] sm:$0xff]  ;;  %v394_v9 = vld [vmem:[#allocation8 + $0x1f8] sm:$0xff]  ;;  %s280_s4 = scalar_lea.vmem [#allocation9], %s647_s18  ;;  %s505_s19 = scalar_lea.hbm %s1141_s3, %s654_s27 }
  0x35   : > { %v310_v4 = vld [vmem:[#allocation8 + $0xb0] sm:$0xff]  ;;  %v391_v6 = vld [vmem:[#allocation8 + $0x1e0] sm:$0xff]  ;;  %415 = vmatpush.msra.mxu3 %v394_v9  ;;  %v392_v12 = vld [vmem:[#allocation8 + $0x1e8] sm:$0xff]  ;;  %s506_s11 = sshll.u32 %s280_s4, 4  ;;  %s508_s10 = sshll.u32 %s505_s19, 4  ;;  %s507_s11 = int_to_ptr.vmem [resolvable:$true] %s506_s11  ;;  %s509_s10 = int_to_ptr.hbm [resolvable:$true] %s508_s10 }
  0x36   : > { %321 = vmatpush.msra.mxu1 %v316_v1  ;;  %v393_v5 = vld [vmem:[#allocation8 + $0x1f0] sm:$0xff]  ;;  %v308_v7 = vld [vmem:[#allocation8 + $0xa0] sm:$0xff]  ;;  %v390_v15 = vld [vmem:[#allocation8 + $0x1d8] sm:$0xff]  ;;  %s491_s20 = scalar_lea.sflag [#allocation5], %s1054_s9  ;;  %s843_s21 = sshra.s32 %s509_s10, 4  ;;  %s844_s21 = int_to_ptr.hbm [resolvable:$true] %s843_s21 }
  0x37   : > { %395 = vmatpush.msra.mxu2 %v393_v5  ;;  %v389_v8 = vld [vmem:[#allocation8 + $0x1d0] sm:$0xff]  ;;  %v387_v11 = vld [vmem:[#allocation8 + $0x1c0] sm:$0xff]  ;;  %416 = vmatpush.msra.mxu3 %v392_v12  ;;  %v388_v18 = vld [vmem:[#allocation8 + $0x1c8] sm:$0xff]  ;;  %s845_s30 = scalar_lea.hbm %s844_s21, 32  ;;  %s849_s2 = scalar_lea.hbm %s1141_s3, 64 }
  0x38   : > { %322 = vmatpush.msra.mxu1 %v314_v2  ;;  %v306_v10 = vld [vmem:[#allocation8 + $0x90] sm:$0xff]  ;;  %v304_v13 = vld [vmem:[#allocation8 + $0x80] sm:$0xff]  ;;  %v386_v21 = vld [vmem:[#allocation8 + $0x1b8] sm:$0xff]  ;;  %p846_p1 = scmp.ne.s32.totalorder %s844_s21, %s845_s30  ;;  %p850_p10 = scmp.lt.s32.totalorder %s844_s21, %s1141_s3 }
  0x39   : > { %396 = vmatpush.msra.mxu2 %v391_v6  ;;  %v385_v14 = vld [vmem:[#allocation8 + $0x1b0] sm:$0xff]  ;;  %v383_v17 = vld [vmem:[#allocation8 + $0x1a0] sm:$0xff]  ;;  %417 = vmatpush.msra.mxu3 %v390_v15  ;;  %v384_v24 = vld [vmem:[#allocation8 + $0x1a8] sm:$0xff]  ;;  %p851_p11 = scmp.lt.s32.totalorder %s849_s2, %s845_s30 }
  0x3a   : > { %323 = vmatpush.msra.mxu1 %v312_v3  ;;  %v302_v16 = vld [vmem:[#allocation8 + $0x70] sm:$0xff]  ;;  %v300_v19 = vld [vmem:[#allocation8 + $0x60] sm:$0xff]  ;;  %v382_v27 = vld [vmem:[#allocation8 + $0x198] sm:$0xff]  ;;  %p847_p3 = pnand %p846_p1, %p1019_p4 }
  0x3b   : > { %397 = vmatpush.msra.mxu2 %v389_v8  ;;  %v381_v20 = vld [vmem:[#allocation8 + $0x190] sm:$0xff]  ;;  %418 = vmatpush.msra.mxu3 %v388_v18  ;;  %v379_v23 = vld [vmem:[#allocation8 + $0x180] sm:$0xff]  ;;  %v380_v30 = vld [vmem:[#allocation8 + $0x188] sm:$0xff]  ;;  %p852_p12 = por %p851_p11, %p850_p10 }
  0x3c   : > { %324 = vmatpush.msra.mxu1 %v310_v4  ;;  %v298_v22 = vld [vmem:[#allocation8 + $0x50] sm:$0xff]  ;;  %v296_v25 = vld [vmem:[#allocation8 + $0x40] sm:$0xff]  ;;  %v378_v33 = vld [vmem:[#allocation8 + $0x178] sm:$0xff]  ;;  %p848_p9 = pneg %p847_p3 }
  0x3d   : > { %398 = vmatpush.msra.mxu2 %v387_v11  ;;  %419 = vmatpush.msra.mxu3 %v386_v21  ;;  %v377_v26 = vld [vmem:[#allocation8 + $0x170] sm:$0xff]  ;;  %v375_v29 = vld [vmem:[#allocation8 + $0x160] sm:$0xff]  ;;  %v376_v36 = vld [vmem:[#allocation8 + $0x168] sm:$0xff] }
  0x3e   : > { %325 = vmatpush.msra.mxu1 %v308_v7  ;;  %v294_v28 = vld [vmem:[#allocation8 + $0x30] sm:$0xff]  ;;  %v292_v31 = vld [vmem:[#allocation8 + $0x20] sm:$0xff]  ;;  %v319_v39 = vld [vmem:[#allocation8 + $0xf8] sm:$0xff]  ;;  %p853_p13 = pnand %p852_p12, %p848_p9 }
  0x3f   : > { %399 = vmatpush.msra.mxu2 %v385_v14  ;;  %420 = vmatpush.msra.mxu3 %v384_v24  ;;  %v373_v32 = vld [vmem:[#allocation8 + $0x150] sm:$0xff]  ;;  %v371_v35 = vld [vmem:[#allocation8 + $0x140] sm:$0xff]  ;;  %v374_v40 = vld [vmem:[#allocation8 + $0x158] sm:$0xff] }
  0x40   : > { %326 = vmatpush.msra.mxu1 %v306_v10  ;;  %v290_v34 = vld [vmem:[#allocation8 + $0x10] sm:$0xff]  ;;  %v288_v37 = vld [vmem:[#allocation8] sm:$0xff]  ;;  %v317_v43 = vld [vmem:[#allocation8 + $0xe8] sm:$0xff] }
  0x41   : > { %400 = vmatpush.msra.mxu2 %v383_v17  ;;  %421 = vmatpush.msra.mxu3 %v382_v27  ;;  %v369_v38 = vld [vmem:[#allocation8 + $0x130] sm:$0xff]  ;;  %v367_v42 = vld [vmem:[#allocation8 + $0x120] sm:$0xff]  ;;  %v372_v44 = vld [vmem:[#allocation8 + $0x148] sm:$0xff] }
  0x42   : > { %327 = vmatpush.msra.mxu1 %v304_v13  ;;  %v1077_v41 = vld [vmem:[%s1058_s25] sm:$0xff]  ;;  %v368_v48 = vld [vmem:[#allocation8 + $0x128] sm:$0xff]  ;;  %v363_v50 = vld [vmem:[#allocation8 + $0x100] sm:$0xff] }
  0x43   : > { %401 = vmatpush.msra.mxu2 %v381_v20  ;;  %422 = vmatpush.msra.mxu3 %v380_v30  ;;  %v370_v45 = vld [vmem:[#allocation8 + $0x138] sm:$0xff]  ;;  %v365_v46 = vld [vmem:[#allocation8 + $0x110] sm:$0xff]  ;;  %v313_v52 = vld [vmem:[#allocation8 + $0xc8] sm:$0xff] }
  0x44   : > { %328 = vmatpush.msra.mxu1 %v302_v16  ;;  %v315_v47 = vld [vmem:[#allocation8 + $0xd8] sm:$0xff]  ;;  %v455_v51 = vld [vmem:[%s1066_s26 + $0x70] sm:$0xff]  ;;  %v454_v54 = vld [vmem:[%s1066_s26 + $0x68] sm:$0xff] }
  0x45   : > { %402 = vmatpush.msra.mxu2 %v379_v23  ;;  %423 = vmatpush.msra.mxu3 %v378_v33  ;;  %v456_v49 = vld [vmem:[%s1066_s26 + $0x78] sm:$0xff]  ;;  %v364_v56 = vld [vmem:[#allocation8 + $0x108] sm:$0xff]  ;;  %v453_v57 = vld [vmem:[%s1066_s26 + $0x60] sm:$0xff] }
  0x46   : > { %329 = vmatpush.msra.mxu1 %v300_v19  ;;  %457 = vmatpush.msra.mxu0 %v456_v49  ;;  %v366_v53 = vld [vmem:[#allocation8 + $0x118] sm:$0xff]  ;;  %v309_v58 = vld [vmem:[#allocation8 + $0xa8] sm:$0xff]  ;;  %v451_v61 = vld [vmem:[%s1066_s26 + $0x50] sm:$0xff] }
  0x47   : > { %403 = vmatpush.msra.mxu2 %v377_v26  ;;  %424 = vmatpush.msra.mxu3 %v376_v36  ;;  %v311_v55 = vld [vmem:[#allocation8 + $0xb8] sm:$0xff]  ;;  %v305_v62 = vld [vmem:[#allocation8 + $0x88] sm:$0xff]  ;;  %v449_v1 = vld [vmem:[%s1066_s26 + $0x40] sm:$0xff] }
  0x48   : > { %330 = vmatpush.msra.mxu1 %v298_v22  ;;  %458 = vmatpush.msra.mxu0 %v455_v51  ;;  %v452_v59 = vld [vmem:[%s1066_s26 + $0x58] sm:$0xff]  ;;  %v450_v63 = vld [vmem:[%s1066_s26 + $0x48] sm:$0xff]  ;;  %v447_v5 = vld [vmem:[%s1066_s26 + $0x30] sm:$0xff] }
  0x49   : > { %404 = vmatpush.msra.mxu2 %v375_v29  ;;  %425 = vmatpush.msra.mxu3 %v374_v40  ;;  %v307_v60 = vld [vmem:[#allocation8 + $0x98] sm:$0xff]  ;;  %v301_v2 = vld [vmem:[#allocation8 + $0x68] sm:$0xff]  ;;  %v445_v9 = vld [vmem:[%s1066_s26 + $0x20] sm:$0xff] }
  0x4a   : > { %331 = vmatpush.msra.mxu1 %v296_v25  ;;  %459 = vmatpush.msra.mxu0 %v454_v54  ;;  %v303_v0 = vld [vmem:[#allocation8 + $0x78] sm:$0xff]  ;;  %v297_v6 = vld [vmem:[#allocation8 + $0x48] sm:$0xff]  ;;  %v443_v13 = vld [vmem:[%s1066_s26 + $0x10] sm:$0xff] }
  0x4b   : > { %405 = vmatpush.msra.mxu2 %v373_v32  ;;  %426 = vmatpush.msra.mxu3 %v372_v44  ;;  %v448_v3 = vld [vmem:[%s1066_s26 + $0x38] sm:$0xff]  ;;  %v446_v7 = vld [vmem:[%s1066_s26 + $0x28] sm:$0xff]  ;;  %v441_v16 = vld [vmem:[%s1066_s26] sm:$0xff] }
  0x4c   : > { %332 = vmatpush.msra.mxu1 %v294_v28  ;;  %460 = vmatpush.msra.mxu0 %v453_v57  ;;  %v299_v4 = vld [vmem:[#allocation8 + $0x58] sm:$0xff]  ;;  %v293_v10 = vld [vmem:[#allocation8 + $0x28] sm:$0xff] }
  0x4d   : > { %406 = vmatpush.msra.mxu2 %v371_v35  ;;  %427 = vmatpush.msra.mxu3 %v370_v45  ;;  %v295_v8 = vld [vmem:[#allocation8 + $0x38] sm:$0xff]  ;;  %v289_v14 = vld [vmem:[#allocation8 + $0x8] sm:$0xff] }
  0x4e   : > { %333 = vmatpush.msra.mxu1 %v292_v31  ;;  %461 = vmatpush.msra.mxu0 %v452_v59  ;;  %v444_v11 = vld [vmem:[%s1066_s26 + $0x18] sm:$0xff]  ;;  %v442_v15 = vld [vmem:[%s1066_s26 + $0x8] sm:$0xff] }
  0x4f   : > { %407 = vmatpush.msra.mxu2 %v369_v38  ;;  %428 = vmatpush.msra.mxu3 %v368_v48  ;;  %v291_v12 = vld [vmem:[#allocation8 + $0x18] sm:$0xff] }
  0x50   : > { %334 = vmatpush.msra.mxu1 %v290_v34  ;;  %462 = vmatpush.msra.mxu0 %v451_v61 }
  0x51   : > { %408 = vmatpush.msra.mxu2 %v367_v42  ;;  %429 = vmatpush.msra.mxu3 %v366_v53 }
  0x52   : > { %335 = vmatpush.msra.mxu1 %v288_v37  ;;  %463 = vmatpush.msra.mxu0 %v450_v63 }
  0x53   : > { %336 = vmatmul.f32.vlgmr.msra.gmra.mxu1 %v1077_v41  ;;  %409 = vmatpush.msra.mxu2 %v365_v46 }
  0x54   : > { %340 = vmatpush.msrb.mxu1 %v319_v39  ;;  %430 = vmatpush.msra.mxu3 %v364_v56 }
  0x55   : > { %410 = vmatpush.msra.mxu2 %v363_v50  ;;  %431 = vmatmul.f32.vlgmr.msra.gmra.mxu3 %v1077_v41 }
  0x56   : > { %341 = vmatpush.msrb.mxu1 %v317_v43  ;;  %411 = vmatmul.f32.vlgmr.msra.gmra.mxu2 %v1077_v41 }
  0x57   : > { %464 = vmatpush.msra.mxu0 %v449_v1 }
  0x58   : > { %342 = vmatpush.msrb.mxu1 %v315_v47 }
  0x59   : > { %465 = vmatpush.msra.mxu0 %v448_v3 }
  0x5a   : > { %343 = vmatpush.msrb.mxu1 %v313_v52 }
  0x5b   : > { %466 = vmatpush.msra.mxu0 %v447_v5 }
  0x5c   : > { %344 = vmatpush.msrb.mxu1 %v311_v55 }
  0x5d   : > { %467 = vmatpush.msra.mxu0 %v446_v7 }
  0x5e   : > { %345 = vmatpush.msrb.mxu1 %v309_v58 }
  0x5f   : > { %468 = vmatpush.msra.mxu0 %v445_v9 }
  0x60   : > { %346 = vmatpush.msrb.mxu1 %v307_v60 }
  0x61   : > { %469 = vmatpush.msra.mxu0 %v444_v11 }
  0x62   : > { %347 = vmatpush.msrb.mxu1 %v305_v62 }
  0x63   : > { %470 = vmatpush.msra.mxu0 %v443_v13 }
  0x64   : > { %348 = vmatpush.msrb.mxu1 %v303_v0 }
  0x65   : > { %471 = vmatpush.msra.mxu0 %v442_v15 }
  0x66   : > { %349 = vmatpush.msrb.mxu1 %v301_v2 }
  0x67   : > { %472 = vmatpush.msra.mxu0 %v441_v16 }
  0x68   : > { %350 = vmatpush.msrb.mxu1 %v299_v4 }
  0x6a   : > { %351 = vmatpush.msrb.mxu1 %v297_v6 }
  0x6c   : > { %352 = vmatpush.msrb.mxu1 %v295_v8 }
  0x6e   : > { %353 = vmatpush.msrb.mxu1 %v293_v10 }
  0x70   : > { %354 = vmatpush.msrb.mxu1 %v291_v12 }
  0x72   : > { %355 = vmatpush.msrb.mxu1 %v289_v14 }
  0x73   : > { %356 = vmatmul.f32.vlgmr.msrb.gmra.mxu1 %v1077_v41 }
  0xd0   : > { %v337_v17 = vpop.f32.mrf.mxu1 }
  0xd1   : > { %473 = vmatmul.f32.vlgmr.msra.gmra.mxu0 %v337_v17 }
  0xd8   : > { %v432_v20 = vpop.f32.mrf.mxu3 }
  0xd9   : > { %v412_v19 = vpop.f32.mrf.mxu2 }
  0xf0   : > { %v357_v18 = vpop.f32.mrf.mxu1 }
  0xf1   : > { %476 = vmatmul.f32.gmra.mxu0 %v357_v18 }
  0xf9   : > { %479 = vmatmul.f32.gmra.mxu0 %v412_v19 }
 0x101   : > { %482 = vmatmul.f32.gmra.mxu0 %v432_v20 }
 0x14e   : > { %v474_v21 = vpop.f32.mrf.mxu0 }
 0x14f   : > { %486 = vst [vmem:[%s280_s4] sm:$0xff] %v474_v21 }
 0x16e   : > { %v477_v22 = vpop.f32.mrf.mxu0 }
 0x16f   : > { %487 = vst [vmem:[%s280_s4 + $0x8] sm:$0xff] %v477_v22 }
 0x176   : > { %v480_v23 = vpop.f32.mrf.mxu0 }
 0x177   : > { %488 = vst [vmem:[%s280_s4 + $0x10] sm:$0xff] %v480_v23 }
 0x17e   : > { %v483_v24 = vpop.f32.mrf.mxu0 }
 0x17f   : > { %489 = vst [vmem:[%s280_s4 + $0x18] sm:$0xff] %v483_v24 }
 0x180   : > { %856 = shalt.err (!%p853_p13)
}
 0x181   : > { %s926_s9 = smov 128   ;;  %s927_s0 = smov 8  }
 0x182   : > { %663 = dma.vmem_to_hbm [thread:$0]  (%p1019_p4), %s507_s11, 512, %s509_s10, %s491_s20, %s926_s9, %s926_s9, %s927_s0  }
 0x183 PF: > { %s523_s22 = sand.u32 1, %s899_s12   ;;  %p677_p0 = pnand %p637_p6, %p1027_p7 }
 0x184   : > { %s524_s28 = scalar_lea.sflag [#allocation5], %s523_s22 }
 0x185   : > { %p678_p2 = pneg %p677_p0 }
 0x187   : > { %894 = dma.done.wait (%p678_p2), %s524_s28, 512  }
 0x188   : > { %896 = vsyncadd (%p678_p2), %s524_s28, 4294966784  ;;  %s22_s17 = sadd.s32 1, %s919_s17   ;;  %s1154_s6 = sld [smem:[#allocation14_spill]] }
 0x189   : > { %p19_p5 = scmp.ge.s32.totalorder %s22_s17, 4   ;;  %s1155_s12 = smov %s903_s13 }
 0x18a   : > { %s1156_s13 = smov %s907_s14  ;;  %s1157_s14 = smov %s1025_s7 }
 0x18b   : > { %s1158_s15 = smov %s915_s16  ;;  %21 = sbr.rel (!%p19_p5) target bundleno = 11 (0xb), region = 100 }
 0x18e   : > { %s1159_s16 = smov %s1154_s6 }
 0x190   :  { %530 = vsyncpa [#allocation4], 1 }
 0x191   :  { %532 = vsyncpa [#allocation4 + $0x1], 1 }
 0x192   :  { %533 = vsyncpa [#allocation7], 1 }
 0x193   :  { %535 = vsyncpa [#allocation7 + $0x1], 1 }
 0x194   :  { %536 = vsyncpa [#allocation5], 1 }
 0x195   :  { %538 = vsyncpa [#allocation5 + $0x1], 1 }

</bundles_post_ra>
